<compile_context>
chip_gen: v7x
topology: tpu7x:2x2x1
jax: 0.10.0
libtpu: 0.0.40
codegen_flags: <defaults>
</compile_context>

<pallas_src>
import jax
import jax.numpy as jnp
from jax.experimental import pallas as pl
from jax.experimental.pallas import tpu as pltpu


def _round_up(x, m):
    return ((x + m - 1) // m) * m


def patch_embed_kernel(p_ref, w_ref, bgb_ref, o_ref):
    # p_ref:   (TM, K) row tile of flattened patches (bf16 or f32), streamed
    # w_ref:   (K, E)  projection weight (conv weight reshaped), resident
    # bgb_ref: (3, E)  fused [bias; gamma; beta] in f32, resident
    # o_ref:   (TM, E) output tile
    y = jnp.dot(p_ref[...], w_ref[...], preferred_element_type=jnp.float32)
    bgb = bgb_ref[...]
    y = y + bgb[0:1, :]                                   # conv bias

    # LayerNorm over E (biased variance, eps=1e-5: torch semantics).
    # Independent reductions instead of the serial mean -> (y-mean)^2 chain;
    # gamma*inv_std folded into one per-row scale, beta - mean*scale into the
    # shift.
    inv_e = 1.0 / y.shape[-1]
    mean = jnp.sum(y, axis=-1, keepdims=True) * inv_e
    mean_sq = jnp.sum(y * y, axis=-1, keepdims=True) * inv_e
    var = jnp.maximum(mean_sq - mean * mean, 0.0)
    inv_std = jax.lax.rsqrt(var + 1e-5)
    scale = inv_std * bgb[1:2, :]
    shift = bgb[2:3, :] - mean * scale
    o_ref[...] = (y * scale + shift).astype(o_ref.dtype)


def _choose_tile_m(rows, K, E, patch_bytes, out_bytes,
                   vmem_budget_bytes=24 << 20, tm_cap=1024, sub=16):
    """Pick the largest row tile that fits the VMEM budget (double-buffered
    patch + output streams plus resident weight), preferring a divisor of
    `rows` so no partial last block / padding copy is needed."""
    lanes_e = _round_up(E, 128)
    lanes_k = _round_up(K, 128)
    resident = 2 * _round_up(K, 16) * lanes_e * patch_bytes + 2 * 8 * lanes_e * 4
    per_row = 2 * (lanes_k * patch_bytes + lanes_e * out_bytes)
    tm_max = max(sub, int((vmem_budget_bytes - resident) // per_row))
    tm_max = min(tm_max, tm_cap)
    if rows <= tm_max:
        # Small problem: one block.  If it is big enough to be worth sharing
        # across v7x's two TensorCores, split it in two even tiles.
        if rows >= 512 and rows % (2 * sub) == 0:
            return rows // 2
        return rows
    tm_max = (tm_max // sub) * sub
    for tm in range(tm_max, sub - 1, -sub):
        if rows % tm == 0:
            return tm                      # exact tiling: no partial block
    return tm_max                          # partial last block, Pallas-masked


def patch_embed(x, weight, bias, gamma, beta, patch_size, *,
                compute_dtype=jnp.bfloat16, out_dtype=None, tile_m=None):
    """x: (B, C, H, W) NCHW.  weight: (E, C, P, P) like nn.Conv2d.

    Returns (out, (Hp, Wp)) with out of shape (B, Hp*Wp, E), matching
    `norm(proj(x).flatten(2).transpose(1, 2))`.
    """
    B, C, H, W = x.shape
    P = patch_size
    assert H % P == 0 and W % P == 0
    Hp, Wp = H // P, W // P
    N = Hp * Wp
    E = weight.shape[0]
    K = C * P * P
    rows = B * N
    if out_dtype is None:
        out_dtype = compute_dtype

    # im2col: flatten patches channel-major (C, Ph, Pw) to match the Conv2d
    # weight layout (E, C, P, P) -> (E, K).  The cast to the compute dtype is
    # fused by XLA into this pass; feed x in bf16 upstream to also halve the
    # read side of this pass.
    patches = x.reshape(B, C, Hp, P, Wp, P).transpose(0, 2, 4, 1, 3, 5)
    patches = patches.reshape(rows, K).astype(compute_dtype)

    w2d = weight.reshape(E, K).T.astype(compute_dtype)          # (K, E)
    bgb = jnp.stack([bias, gamma, beta]).astype(jnp.float32)    # (3, E)

    patch_bytes = jnp.dtype(compute_dtype).itemsize
    out_bytes = jnp.dtype(out_dtype).itemsize
    if tile_m is None:
        tm = _choose_tile_m(rows, K, E, patch_bytes, out_bytes)
    else:
        tm = min(tile_m, rows)
        if tm < rows:
            tm = max(16, (tm // 16) * 16)
    grid_m = pl.cdiv(rows, tm)

    # Explicit VMEM limit: generous headroom over the estimated footprint,
    # capped below v7x's 64 MiB physical VMEM.
    lanes_e = _round_up(E, 128)
    est = (2 * tm * _round_up(K, 128) * patch_bytes      # patches (dbl-buf)
           + 2 * tm * lanes_e * out_bytes                # output  (dbl-buf)
           + 2 * _round_up(K, 16) * lanes_e * patch_bytes  # weight
           + 2 * 8 * lanes_e * 4)                        # bias/gamma/beta
    vmem_limit = int(min(max(2 * est, 32 << 20), 56 << 20))

    out = pl.pallas_call(
        patch_embed_kernel,
        out_shape=jax.ShapeDtypeStruct((rows, E), out_dtype),
        grid_spec=pltpu.PrefetchScalarGridSpec(
            num_scalar_prefetch=0,
            grid=(grid_m,),
            in_specs=[
                pl.BlockSpec((tm, K), lambda i: (i, 0)),   # patches (streamed)
                pl.BlockSpec((K, E), lambda i: (0, 0)),    # weight (resident)
                pl.BlockSpec((3, E), lambda i: (0, 0)),    # bias/gamma/beta
            ],
            out_specs=pl.BlockSpec((tm, E), lambda i: (i, 0)),
        ),
        compiler_params=pltpu.CompilerParams(
            dimension_semantics=("parallel",),
            vmem_limit_bytes=vmem_limit),
    )(patches, w2d, bgb)

    return out.reshape(B, N, E), (Hp, Wp)


def patch_embed_ref(x, weight, bias, gamma, beta, patch_size):
    """Pure-JAX f32 reference mirroring the PyTorch forward."""
    B, C, H, W = x.shape
    P = patch_size
    Hp, Wp = H // P, W // P
    E = weight.shape[0]
    patches = x.reshape(B, C, Hp, P, Wp, P).transpose(0, 2, 4, 1, 3, 5)
    patches = patches.reshape(B, Hp * Wp, C * P * P)
    y = patches @ weight.reshape(E, -1).T + bias
    mean = jnp.mean(y, axis=-1, keepdims=True)
    var = jnp.mean((y - mean) ** 2, axis=-1, keepdims=True)
    y = (y - mean) / jnp.sqrt(var + 1e-5)
    return y * gamma + beta, (Hp, Wp)


if __name__ == "__main__":
    # Small shapes consistent with the module: img_size=16, patch_size=4,
    # in_chans=4, embed_dim=32  -> 16 patches of dim 32 per image.
    B, C, H, W = 2, 4, 16, 16
    P = 4
    E = 32

    key = jax.random.PRNGKey(0)
    kx, kw, kb, kg, kbt = jax.random.split(key, 5)
    x = jax.random.normal(kx, (B, C, H, W), dtype=jnp.float32)
    weight = 0.02 * jax.random.normal(kw, (E, C, P, P), dtype=jnp.float32)
    bias = 0.01 * jax.random.normal(kb, (E,), dtype=jnp.float32)
    gamma = 1.0 + 0.05 * jax.random.normal(kg, (E,), dtype=jnp.float32)
    beta = 0.05 * jax.random.normal(kbt, (E,), dtype=jnp.float32)

    ref, (Hp, Wp) = patch_embed_ref(x, weight, bias, gamma, beta, P)

    # 1) f32 compute / f32 output, auto tile (single block): exact semantics.
    out32, hw = patch_embed(x, weight, bias, gamma, beta, P,
                            compute_dtype=jnp.float32, out_dtype=jnp.float32)
    out32 = jax.block_until_ready(out32)
    assert out32.shape == (B, Hp * Wp, E) and hw == (Hp, Wp)
    assert jnp.allclose(out32, ref, atol=1e-4, rtol=1e-4)

    # 2) f32 path with an explicit multi-tile grid (exercises row tiling).
    out32t, _ = patch_embed(x, weight, bias, gamma, beta, P,
                            compute_dtype=jnp.float32, out_dtype=jnp.float32,
                            tile_m=16)
    out32t = jax.block_until_ready(out32t)
    assert jnp.allclose(out32t, ref, atol=1e-4, rtol=1e-4)

    # 3) Default perf path: bf16 feed, f32 accumulate + f32 LayerNorm, bf16
    #    store.  Looser tolerance against the f32 reference.
    out16, _ = patch_embed(x, weight, bias, gamma, beta, P)
    out16 = jax.block_until_ready(out16)
    assert out16.dtype == jnp.bfloat16
    assert jnp.allclose(out16.astype(jnp.float32), ref, atol=5e-2, rtol=5e-2)

    print("KERNEL_OK")
</pallas_src>

<mosaic_0001>
module attributes {stable_mosaic.version = 11 : i64} {
  func.func @patch_embed_kernel(%arg0: i32, %arg1: memref<32x64xf32, #tpu.memory_space<vmem>>, %arg2: memref<64x32xf32, #tpu.memory_space<vmem>>, %arg3: memref<3x32xf32, #tpu.memory_space<vmem>>, %arg4: memref<32x32xf32, #tpu.memory_space<vmem>>) attributes {dimension_semantics = [#tpu.dimension_semantics<parallel>], iteration_bounds = array<i64: 1>, scalar_prefetch = 0 : i64, scratch_operands = 0 : i64, tpu.core_type = #tpu.core_type<tc>, window_params = [{transform_indices = @transform_0, window_bounds = array<i64: 32, 64>}, {pipeline_mode = #tpu.pipeline_mode<synchronous>, transform_indices = @transform_1, window_bounds = array<i64: 64, 32>}, {pipeline_mode = #tpu.pipeline_mode<synchronous>, transform_indices = @transform_2, window_bounds = array<i64: 3, 32>}, {transform_indices = @transform_3, window_bounds = array<i64: 32, 32>}]} {
    %c0 = arith.constant 0 : index
    %c0_0 = arith.constant 0 : index
    %0 = vector.load %arg1[%c0, %c0_0] : memref<32x64xf32, #tpu.memory_space<vmem>>, vector<32x64xf32>
    %c0_1 = arith.constant 0 : index
    %c0_2 = arith.constant 0 : index
    %1 = vector.load %arg2[%c0_1, %c0_2] : memref<64x32xf32, #tpu.memory_space<vmem>>, vector<64x32xf32>
    %cst = arith.constant dense<0.000000e+00> : vector<32x32xf32>
    %2 = tpu.matmul %0, %1, %cst {dimension_numbers = #tpu.dot_dimension_numbers<[1], [0], [0], [1], [0, 0, 1, 1], [], []>} : vector<32x64xf32>, vector<64x32xf32>, vector<32x32xf32> -> vector<32x32xf32>
    %c0_3 = arith.constant 0 : index
    %c0_4 = arith.constant 0 : index
    %3 = vector.load %arg3[%c0_3, %c0_4] : memref<3x32xf32, #tpu.memory_space<vmem>>, vector<3x32xf32>
    %4 = vector.extract_strided_slice %3 {offsets = [0, 0], sizes = [1, 32], strides = [1, 1]} : vector<3x32xf32> to vector<1x32xf32>
    %5 = vector.broadcast %4 : vector<1x32xf32> to vector<32x32xf32>
    %6 = arith.addf %2, %5 : vector<32x32xf32>
    %cst_5 = arith.constant dense<0.000000e+00> : vector<32xf32>
    %7 = vector.multi_reduction <add>, %6, %cst_5 [1] : vector<32x32xf32> to vector<32xf32>
    %8 = vector.shape_cast %7 : vector<32xf32> to vector<32x1xf32>
    %cst_6 = arith.constant 3.125000e-02 : f32
    %9 = vector.broadcast %cst_6 : f32 to vector<32x1xf32>
    %10 = arith.mulf %8, %9 : vector<32x1xf32>
    %11 = arith.mulf %6, %6 : vector<32x32xf32>
    %cst_7 = arith.constant dense<0.000000e+00> : vector<32xf32>
    %12 = vector.multi_reduction <add>, %11, %cst_7 [1] : vector<32x32xf32> to vector<32xf32>
    %13 = vector.shape_cast %12 : vector<32xf32> to vector<32x1xf32>
    %cst_8 = arith.constant 3.125000e-02 : f32
    %14 = vector.broadcast %cst_8 : f32 to vector<32x1xf32>
    %15 = arith.mulf %13, %14 : vector<32x1xf32>
    %16 = arith.mulf %10, %10 : vector<32x1xf32>
    %17 = arith.subf %15, %16 : vector<32x1xf32>
    %cst_9 = arith.constant 0.000000e+00 : f32
    %18 = vector.broadcast %cst_9 : f32 to vector<32x1xf32>
    %19 = arith.maximumf %17, %18 : vector<32x1xf32>
    %cst_10 = arith.constant 9.99999974E-6 : f32
    %20 = vector.broadcast %cst_10 : f32 to vector<32x1xf32>
    %21 = arith.addf %19, %20 : vector<32x1xf32>
    %22 = math.rsqrt %21 : vector<32x1xf32>
    %23 = vector.extract_strided_slice %3 {offsets = [1, 0], sizes = [1, 32], strides = [1, 1]} : vector<3x32xf32> to vector<1x32xf32>
    %24 = vector.broadcast %22 : vector<32x1xf32> to vector<32x32xf32>
    %25 = vector.broadcast %23 : vector<1x32xf32> to vector<32x32xf32>
    %26 = arith.mulf %24, %25 : vector<32x32xf32>
    %27 = vector.extract_strided_slice %3 {offsets = [2, 0], sizes = [1, 32], strides = [1, 1]} : vector<3x32xf32> to vector<1x32xf32>
    %28 = vector.broadcast %10 : vector<32x1xf32> to vector<32x32xf32>
    %29 = arith.mulf %28, %26 : vector<32x32xf32>
    %30 = vector.broadcast %27 : vector<1x32xf32> to vector<32x32xf32>
    %31 = arith.subf %30, %29 : vector<32x32xf32>
    %32 = arith.mulf %6, %26 : vector<32x32xf32>
    %33 = arith.addf %32, %31 : vector<32x32xf32>
    %c0_11 = arith.constant 0 : index
    %c0_12 = arith.constant 0 : index
    %34 = vector.load %arg4[%c0_11, %c0_12] : memref<32x32xf32, #tpu.memory_space<vmem>>, vector<32x32xf32>
    tpu.vector_store %arg4[%c0_11, %c0_12], %33 {strides = array<i32>} : memref<32x32xf32, #tpu.memory_space<vmem>>, vector<32x32xf32>,
    return
  }
  func.func @transform_0(%arg0: i32) -> (i32, i32) {
    %c0_i32 = arith.constant 0 : i32
    %c0_i32_0 = arith.constant 0 : i32
    return %arg0, %c0_i32 : i32, i32
  }
  func.func @transform_1(%arg0: i32) -> (i32, i32) {
    %c0_i32 = arith.constant 0 : i32
    %c0_i32_0 = arith.constant 0 : i32
    %c0_i32_1 = arith.constant 0 : i32
    return %c0_i32, %c0_i32_0 : i32, i32
  }
  func.func @transform_2(%arg0: i32) -> (i32, i32) {
    %c0_i32 = arith.constant 0 : i32
    %c0_i32_0 = arith.constant 0 : i32
    %c0_i32_1 = arith.constant 0 : i32
    return %c0_i32, %c0_i32_0 : i32, i32
  }
  func.func @transform_3(%arg0: i32) -> (i32, i32) {
    %c0_i32 = arith.constant 0 : i32
    %c0_i32_0 = arith.constant 0 : i32
    return %arg0, %c0_i32 : i32, i32
  }
}

</mosaic_0001>

<bundles_post_ra>
// kernel: tpu_custom_call.1
= control target key start
LH: loop header
LB: loop body
LE: loop exit
PB: predicated region body
PF: predicated region fallthrough
CT: control target
= control target key end

     0   :  { %vm32_vm0 = vcmask 523264   ;;  %s456_s0 = inlined_call_operand.vmem [shape: f32[32,64], index: 0, kind: input, shape index: {}]   ;;  %s457_s1 = inlined_call_operand.vmem [shape: f32[64,32], index: 1, kind: input, shape index: {}]   ;;  %s458_s2 = inlined_call_operand.vmem [shape: f32[3,32], index: 2, kind: input, shape index: {}]   ;;  %s459_s3 = inlined_call_operand.hbm [shape: f32[32,32], index: 3, kind: output, shape index: {}]  }
   0x1   :  { %v19_v0 = vld [vmem:[%s457_s1] sm:$0xff]  ;;  %v20_v1 = vld [vmem:[%s457_s1 + $0x8] sm:$0xff]  ;;  %v21_v2 = vld [vmem:[%s457_s1 + $0x10] sm:$0xff] }
   0x2   :  { %v273_v3 = vpack.c.bf16 %v20_v1, %v19_v0  ;;  %v22_v4 = vld [vmem:[%s457_s1 + $0x18] sm:$0xff]  ;;  %v23_v6 = vld [vmem:[%s457_s1 + $0x20] sm:$0xff]  ;;  %v24_v7 = vld [vmem:[%s457_s1 + $0x28] sm:$0xff] }
   0x3   :  { %v277_v5 = vpack.c.bf16 %v22_v4, %v21_v2  ;;  %v15_v8 = vld [vmem:[%s456_s0] sm:$0xff]  ;;  %v17_v9 = vld [vmem:[%s456_s0 + $0x10] sm:$0xff] }
   0x4   :  { %274 = vmatprep.subr.bf16.mxu0 %v273_v3  ;;  %289 = vmatprep.subr.bf16.mxu1 %v273_v3 }
   0x5   :  { %276 = vmatpush3.bf16.msra.mxu0 %v273_v3  ;;  %293 = vmatpush3.bf16.msra.mxu1 %v273_v3 }
   0x6   :  { %8 = vsyncpa [#allocation3], 0  ;;  %278 = vmatprep.subr.bf16.mxu0 %v277_v5  ;;  %290 = vmatprep.subr.bf16.mxu1 %v277_v5  ;;  %v281_v10 = vpack.c.bf16 %v24_v7, %v23_v6  ;;  %v25_v11 = vld [vmem:[%s457_s1 + $0x30] sm:$0xff]  ;;  %v26_v12 = vld [vmem:[%s457_s1 + $0x38] sm:$0xff]  ;;  %v28_v16 = vlaneseq  ;;  %vm130_vm1 = vcmask 261120  }
   0x7   :  { %267 = vmatprep.mubr.msk.f32.mxu0 %vm32_vm0, %v15_v8  ;;  %270 = vmatprep.mubr.msk.f32.mxu1 %vm32_vm0, %v17_v9  ;;  %v285_v13 = vpack.c.bf16 %v26_v12, %v25_v11  ;;  %v16_v14 = vld [vmem:[%s456_s0 + $0x8] sm:$0xff]  ;;  %v18_v15 = vld [vmem:[%s456_s0 + $0x18] sm:$0xff]  ;;  %v401_v19 = vld [vmem:[%s458_s2] sm:$0x7]  ;;  %s332_s0 = smov [#allocation2]  }
   0x8   :  { %v395_v17 = vshrl.u32 %v28_v16, 7  ;;  %s224_s2 = sshll.u32 %s332_s0, 4  ;;  %s225_s2 = int_to_ptr.vmem [resolvable:$true] %s224_s2 }
   0x9   :  { %280 = vmatpush3.bf16.msra.mxu0 %v277_v5  ;;  %294 = vmatpush3.bf16.msra.mxu1 %v277_v5  ;;  %s308_s10 = scalar_lea.vmem %s225_s2, 512  ;;  %p313_p1 = scmp.lt.s32.totalorder %s225_s2, %s225_s2 }
   0xa   :  { %282 = vmatprep.subr.bf16.mxu0 %v281_v10  ;;  %291 = vmatprep.subr.bf16.mxu1 %v281_v10  ;;  %v30_v18 = vsub.s32 0, %v395_v17  ;;  %v189_v9 = vsub.s32 1, %v395_v17  ;;  %v201_v11 = vsub.s32 2, %v395_v17  ;;  %p309_p0 = scmp.ne.s32.totalorder %s225_s2, %s308_s10  ;;  %p314_p2 = scmp.lt.s32.totalorder %s308_s10, %s308_s10 }
   0xc   :  { %v31_v20 = vrot.slane %v401_v19, %v30_v18  ;;  %p315_p3 = por %p314_p2, %p313_p1 }
   0xd   :  { %284 = vmatpush3.bf16.msra.mxu0 %v281_v10  ;;  %295 = vmatpush3.bf16.msra.mxu1 %v281_v10  ;;  %v190_v10 = vrot.slane %v401_v19, %v189_v9 }
   0xe   :  { %286 = vmatprep.subr.bf16.mxu0 %v285_v13  ;;  %292 = vmatprep.subr.bf16.mxu1 %v285_v13  ;;  %p316_p4 = pnand %p315_p3, %p309_p0 }
  0x11   :  { %288 = vmatpush3.bf16.msra.mxu0 %v285_v13  ;;  %296 = vmatpush3.bf16.msra.mxu1 %v285_v13 }
  0x14   :  { %268 = vmatmul.mubr.msk.f32.vlgmr.msra.gmra.mrb[0].mxu0 %vm32_vm0, %v16_v14  ;;  %271 = vmatmul.mubr.msk.f32.vlgmr.msra.gmra.mrb[0].mxu1 %vm32_vm0, %v18_v15  ;;  %v202_v14 = vrot.slane %v401_v19, %v201_v11 }
  0xe7   :  { %v269_v21 = vpop.f32.mrb[0].mxu0  ;;  %v272_v22 = vpop.f32.mrb[0].mxu1 }
  0xe8   :  { %v404_v23 = vadd.f32 %v269_v21, %v31_v20  ;;  %v406_v24 = vadd.f32 %v272_v22, %v31_v20  ;;  %v111_v25 = vpop.f32.mrb[1].mxu0  ;;  %v121_v26 = vpop.f32.mrb[1].mxu1 }
  0xe9   :  { %v408_v27 = vadd.f32 %v111_v25, %v31_v20  ;;  %v410_v28 = vadd.f32 %v121_v26, %v31_v20 }
  0xea   :  { %v140_v29 = vsel %vm130_vm1, %v406_v24, 0.0  ;;  %v134_v30 = vsel %vm130_vm1, %v404_v23, 0.0  ;;  %v148_v33 = vmul.f32 %v404_v23, %v404_v23  ;;  %v150_v37 = vmul.f32 %v406_v24, %v406_v24 }
  0xeb   :  { %141 = vadd.xlane.f32.xlu1 %v140_v29  ;;  %135 = vadd.xlane.f32.xlu0 %v134_v30  ;;  %v137_v31 = vsel %vm130_vm1, %v410_v28, 0.0  ;;  %v131_v32 = vsel %vm130_vm1, %v408_v27, 0.0  ;;  %v147_v34 = vmul.f32 %v408_v27, %v408_v27  ;;  %v149_v38 = vmul.f32 %v410_v28, %v410_v28 }
  0xec   :  { %v154_v35 = vsel %vm130_vm1, %v148_v33, 0.0  ;;  %v160_v39 = vsel %vm130_vm1, %v150_v37, 0.0 }
  0xed   :  { %v151_v36 = vsel %vm130_vm1, %v147_v34, 0.0  ;;  %v157_v40 = vsel %vm130_vm1, %v149_v38, 0.0 }
  0xef   :  { %138 = vadd.xlane.f32.xlu1 %v137_v31  ;;  %132 = vadd.xlane.f32.xlu0 %v131_v32 }
  0xf3   :  { %155 = vadd.xlane.f32.xlu1 %v154_v35  ;;  %152 = vadd.xlane.f32.xlu0 %v151_v36 }
  0xf7   :  { %161 = vadd.xlane.f32.xlu1 %v160_v39  ;;  %158 = vadd.xlane.f32.xlu0 %v157_v40 }
 0x178   :  { %v142_v41 = vpop.xlane.xlu1 %141  ;;  %v136_v42 = vpop.xlane.xlu0 %135 }
 0x179   :  { %v144_v45 = vmul.f32 0.03125, %v136_v42  ;;  %v146_v47 = vmul.f32 0.03125, %v142_v41 }
 0x17b   :  { %v168_v51 = vmul.f32 %v144_v45, %v144_v45  ;;  %v170_v57 = vmul.f32 %v146_v47, %v146_v47 }
 0x17c   :  { %v139_v43 = vpop.xlane.xlu1 %138  ;;  %v133_v44 = vpop.xlane.xlu0 %132 }
 0x17d   :  { %v143_v46 = vmul.f32 0.03125, %v133_v44  ;;  %v145_v48 = vmul.f32 0.03125, %v139_v43 }
 0x17f   :  { %v167_v52 = vmul.f32 %v143_v46, %v143_v46  ;;  %v169_v58 = vmul.f32 %v145_v48, %v145_v48 }
 0x180   :  { %v156_v49 = vpop.xlane.xlu1 %155  ;;  %v153_v50 = vpop.xlane.xlu0 %152 }
 0x181   :  { %v164_v53 = vmul.f32 0.03125, %v156_v49  ;;  %v163_v54 = vmul.f32 0.03125, %v153_v50 }
 0x183   :  { %v172_v55 = vsub.f32 %v164_v53, %v168_v51  ;;  %v171_v56 = vsub.f32 %v163_v54, %v167_v52 }
 0x184   :  { %v162_v59 = vpop.xlane.xlu1 %161  ;;  %v159_v60 = vpop.xlane.xlu0 %158 }
 0x185   :  { %v176_v61 = vmax.f32 %v172_v55, 0.0  ;;  %v175_v62 = vmax.f32 %v171_v56, 0.0  ;;  %v166_v63 = vmul.f32 0.03125, %v162_v59  ;;  %v165_v0 = vmul.f32 0.03125, %v159_v60 }
 0x187   :  { %v180_v1 = vadd.f32 1e-05, %v176_v61  ;;  %v179_v2 = vadd.f32 1e-05, %v175_v62  ;;  %v174_v3 = vsub.f32 %v166_v63, %v170_v57  ;;  %v173_v4 = vsub.f32 %v165_v0, %v169_v58 }
 0x189   :  { %300 = vrsqrt.f32 %v180_v1  ;;  %v178_v5 = vmax.f32 %v174_v3, 0.0  ;;  %v177_v6 = vmax.f32 %v173_v4, 0.0 }
 0x18a   :  { %302 = vrsqrt.f32 %v179_v2 }
 0x18b   :  { %v182_v7 = vadd.f32 1e-05, %v178_v5  ;;  %v181_v8 = vadd.f32 1e-05, %v177_v6 }
 0x18d   :  { %304 = vrsqrt.f32 %v182_v7 }
 0x18e   :  { %306 = vrsqrt.f32 %v181_v8 }
 0x193   :  { %v301_v12 = vpop.eup %300 }
 0x194   :  { %v303_v13 = vpop.eup %302  ;;  %v192_v15 = vmul.f32 %v301_v12, %v190_v10 }
 0x195   :  { %v191_v16 = vmul.f32 %v303_v13, %v190_v10 }
 0x196   :  { %v196_v18 = vmul.f32 %v192_v15, %v144_v45  ;;  %v208_v26 = vmul.f32 %v192_v15, %v404_v23 }
 0x197   :  { %v305_v20 = vpop.eup %304  ;;  %v195_v21 = vmul.f32 %v191_v16, %v143_v46  ;;  %v207_v31 = vmul.f32 %v191_v16, %v408_v27 }
 0x198   :  { %v307_v22 = vpop.eup %306  ;;  %v204_v25 = vsub.f32 %v202_v14, %v196_v18  ;;  %v194_v29 = vmul.f32 %v305_v20, %v190_v10 }
 0x199   :  { %v203_v30 = vsub.f32 %v202_v14, %v195_v21  ;;  %v193_v32 = vmul.f32 %v307_v22, %v190_v10 }
 0x19a   :  { %v198_v33 = vmul.f32 %v194_v29, %v146_v47  ;;  %v212_v17 = vadd.f32 %v208_v26, %v204_v25  ;;  %v210_v36 = vmul.f32 %v194_v29, %v406_v24 }
 0x19b   :  { %v197_v34 = vmul.f32 %v193_v32, %v145_v48  ;;  %v211_v35 = vadd.f32 %v207_v31, %v203_v30  ;;  %v209_v38 = vmul.f32 %v193_v32, %v410_v28 }
 0x19c   :  { %v206_v19 = vsub.f32 %v202_v14, %v198_v33  ;;  %216 = vst.msk [vmem:[#allocation2 + $0x8] sm:$0xff] %vm130_vm1, %v212_v17 }
 0x19d   :  { %v205_v37 = vsub.f32 %v202_v14, %v197_v34  ;;  %215 = vst.msk [vmem:[#allocation2] sm:$0xff] %vm130_vm1, %v211_v35 }
 0x19e   :  { %v214_v23 = vadd.f32 %v210_v36, %v206_v19 }
 0x19f   :  { %v213_v27 = vadd.f32 %v209_v38, %v205_v37 }
 0x1a0   :  { %218 = vst.msk [vmem:[#allocation2 + $0x18] sm:$0xff] %vm130_vm1, %v214_v23 }
 0x1a1   :  { %217 = vst.msk [vmem:[#allocation2 + $0x10] sm:$0xff] %vm130_vm1, %v213_v27 }
 0x1a2   :  { %319 = shalt.err (!%p316_p4)
}
 0x1a3   :  { %s320_s13 = scalar_lea.hbm %s459_s3, 512 }
 0x1a4   :  { %p321_p5 = scmp.ne.s32.totalorder %s459_s3, %s320_s13  ;;  %p324_p6 = scmp.lt.u32.totalorder %s320_s13, %s459_s3 }
 0x1a6   :  { %p326_p7 = pnand %p324_p6, %p321_p5 }
 0x1a8   :  { %329 = shalt.err (!%p326_p7)
}
 0x1a9   :  { %s333_s18 = smov 128   ;;  %s334_s19 = smov 8  }
 0x1aa   :  { %230 = dma.vmem_to_hbm [thread:$0]  %s225_s2, 512, %s459_s3, [#allocation3], %s333_s18, %s333_s18, %s334_s19  }
 0x1ab   :  { %330 = dma.done.wait [#allocation3], 512  }
 0x1ac   :  { %331 = vsyncadd [#allocation3], 4294966784 }
 0x1ad   :  { %234 = vsyncpa [#allocation3], 1 }

</bundles_post_ra>
